<compile_context>
chip_gen: v7x
topology: tpu7x:2x2x1
jax: 0.10.0
libtpu: 0.0.40
codegen_flags: <defaults>
</compile_context>

<pallas_src>
import functools
import math

import jax
import jax.numpy as jnp
from jax import lax
from jax.experimental import pallas as pl
from jax.experimental.pallas import tpu as pltpu


# ----------------------------- kernels ---------------------------------------

def _gcn_prop_kernel(x_ref, at_ref, h_ref, *, support_len, order, c_in):
    """Graph propagation for one batch element.

    x_ref : (C, V, L)          activations (native NCHW slice, no transpose)
    at_ref: (S, V, V)          A_s^T for each support (resident in VMEM)
    h_ref : (S*order*C, V, L)  all propagated terms, k-major / c-minor
    """
    for s in range(support_len):
        a_t = at_ref[s]                                   # (V, V) == A_s^T
        for c in range(c_in):
            t = x_ref[c]                                  # (V, L)
            for p in range(order):
                # x_{p+1}[w, l] = sum_v A[v, w] x_p[v, l]  ==  A^T @ x_p   (MXU)
                t = lax.dot_general(
                    a_t, t, (((1,), (0,)), ((), ())),
                    preferred_element_type=jnp.float32)
                h_ref[(s * order + p) * c_in + c] = t.astype(h_ref.dtype)


def _gcn_conv_kernel(x_ref, h_ref, w0_ref, wr_ref, b_ref, o_ref):
    """1x1 Conv2d (channel contraction) for one batch element, lane-dense output.

    x_ref : (C, V*L)            identity term
    h_ref : (S*order*C, V*L)    propagated terms from kernel 1
    w0_ref: (C_out, C)          weight columns for the identity term
    wr_ref: (C_out, S*order*C)  weight columns for the propagated terms
    b_ref : (C_out, 1)
    o_ref : (C_out, V*L)
    """
    dn = (((1,), (0,)), ((), ()))
    acc = lax.dot_general(w0_ref[...], x_ref[...], dn,
                          preferred_element_type=jnp.float32)
    acc = acc + lax.dot_general(wr_ref[...], h_ref[...], dn,
                                preferred_element_type=jnp.float32)
    o_ref[...] = (acc + b_ref[...]).astype(o_ref.dtype)


# -------------------------- module forward -----------------------------------

def gcn_forward(x, supports, weight, bias, order=2):
    """Matches gcn.forward (dropout is identity at inference)."""
    n, c_in, v, l = x.shape
    s = len(supports)
    k = s * order                         # number of propagated terms
    c_big = (k + 1) * c_in
    c_out = weight.shape[0]
    m = v * l

    # One-time, tiny parameter massaging (weights only — no activation traffic).
    at = jnp.stack([jnp.transpose(a) for a in supports], axis=0)      # (S, V, V)
    w2d = weight.reshape(c_out, c_big)
    w0 = w2d[:, :c_in]                                                # identity term
    wr = w2d[:, c_in:]                                                # k-major / c-minor
    b2 = bias.reshape(c_out, 1)

    # 32 MiB scoped VMEM is safe on v7x (64 MiB physical); raise to 64-96 MiB on
    # v5e/v6e (128 MiB physical) for larger blocks.
    vmem = 32 * 1024 * 1024

    # ---- kernel 1: propagation over all supports & orders, grid over batch ----
    prop_cost = pl.CostEstimate(
        flops=2 * n * k * c_in * v * v * l,
        transcendentals=0,
        bytes_accessed=4 * (x.size + at.size + n * k * c_in * v * l))
    h = pl.pallas_call(
        functools.partial(_gcn_prop_kernel,
                          support_len=s, order=order, c_in=c_in),
        out_shape=jax.ShapeDtypeStruct((n, k * c_in, v, l), x.dtype),
        grid=(n,),
        in_specs=[
            pl.BlockSpec((None, c_in, v, l), lambda i: (i, 0, 0, 0)),
            pl.BlockSpec((s, v, v), lambda i: (0, 0, 0)),       # resident supports
        ],
        out_specs=pl.BlockSpec((None, k * c_in, v, l), lambda i: (i, 0, 0, 0)),
        compiler_params=pltpu.CompilerParams(
            dimension_semantics=("parallel",), vmem_limit_bytes=vmem),
        cost_estimate=prop_cost,
    )(x, at)

    # ---- kernel 2: 1x1 conv with lane-dense V*L minor axis, grid over batch ----
    x2 = x.reshape(n, c_in, m)            # free reshapes (contiguous collapse)
    h2 = h.reshape(n, k * c_in, m)
    conv_cost = pl.CostEstimate(
        flops=2 * n * c_out * c_big * m,
        transcendentals=0,
        bytes_accessed=4 * (x2.size + h2.size + w2d.size + bias.size + n * c_out * m))
    out2 = pl.pallas_call(
        _gcn_conv_kernel,
        out_shape=jax.ShapeDtypeStruct((n, c_out, m), x.dtype),
        grid=(n,),
        in_specs=[
            pl.BlockSpec((None, c_in, m), lambda i: (i, 0, 0)),
            pl.BlockSpec((None, k * c_in, m), lambda i: (i, 0, 0)),
            pl.BlockSpec((c_out, c_in), lambda i: (0, 0)),      # resident weights
            pl.BlockSpec((c_out, k * c_in), lambda i: (0, 0)),  # resident weights
            pl.BlockSpec((c_out, 1), lambda i: (0, 0)),         # resident bias
        ],
        out_specs=pl.BlockSpec((None, c_out, m), lambda i: (i, 0, 0)),
        compiler_params=pltpu.CompilerParams(
            dimension_semantics=("parallel",), vmem_limit_bytes=vmem),
        cost_estimate=conv_cost,
    )(x2, h2, w0, wr, b2)

    # TODO(synk): F.dropout is identity at inference (training=False); omitted.
    return out2.reshape(n, c_out, v, l)


# ----------------------- pure-JAX reference ----------------------------------

def gcn_reference(x, supports, weight, bias, order=2):
    out = [x]
    for a in supports:
        x1 = jnp.einsum('ncvl,vw->ncwl', x, a)
        out.append(x1)
        x_prev = x1
        for _ in range(2, order + 1):
            x2 = jnp.einsum('ncvl,vw->ncwl', x_prev, a)
            out.append(x2)
            x_prev = x2
    h = jnp.concatenate(out, axis=1)
    w2d = weight.reshape(weight.shape[0], -1)
    return jnp.einsum('oc,ncvl->novl', w2d, h) + bias[None, :, None, None]


if __name__ == "__main__":
    key = jax.random.PRNGKey(0)
    kx, ka, kw, kb = jax.random.split(key, 4)

    # Small shapes consistent with the module: x is (batch, c_in, nodes, time).
    # V * L = 128 so kernel 2's output tile is lane-dense.
    N, C_IN, V, L = 2, 4, 16, 8
    SUPPORT_LEN, ORDER = 3, 2
    C_BIG = (ORDER * SUPPORT_LEN + 1) * C_IN      # 28
    C_OUT = 32

    x = jax.random.normal(kx, (N, C_IN, V, L), dtype=jnp.float32)
    supports = [
        jax.random.normal(jax.random.fold_in(ka, i), (V, V), dtype=jnp.float32) * 0.1
        for i in range(SUPPORT_LEN)
    ]
    # Conv2d(c_in_big, c_out, kernel_size=(1,1), bias=True) parameters.
    weight = jax.random.normal(kw, (C_OUT, C_BIG, 1, 1), dtype=jnp.float32) * (
        1.0 / math.sqrt(C_BIG)
    )
    bias = jax.random.normal(kb, (C_OUT,), dtype=jnp.float32) * 0.01

    out = jax.block_until_ready(gcn_forward(x, supports, weight, bias, ORDER))
    ref = gcn_reference(x, supports, weight, bias, ORDER)

    assert out.shape == (N, C_OUT, V, L), out.shape
    assert out.dtype == jnp.float32
    assert jnp.allclose(out, ref, rtol=1e-4, atol=1e-4), float(jnp.max(jnp.abs(out - ref)))
    print("KERNEL_OK")
</pallas_src>

<mosaic_0001>
module attributes {stable_mosaic.version = 11 : i64} {
  func.func @_gcn_prop_kernel(%arg0: i32, %arg1: memref<1x4x16x8xf32, #tpu.memory_space<vmem>>, %arg2: memref<3x16x16xf32, #tpu.memory_space<vmem>>, %arg3: memref<1x24x16x8xf32, #tpu.memory_space<vmem>>) attributes {dimension_semantics = [#tpu.dimension_semantics<parallel>], iteration_bounds = array<i64: 2>, scalar_prefetch = 0 : i64, scratch_operands = 0 : i64, tpu.core_type = #tpu.core_type<tc>, window_params = [{transform_indices = @transform_0, window_bounds = array<i64: 1, 4, 16, 8>}, {pipeline_mode = #tpu.pipeline_mode<synchronous>, transform_indices = @transform_1, window_bounds = array<i64: 3, 16, 16>}, {transform_indices = @transform_2, window_bounds = array<i64: 1, 24, 16, 8>}]} {
    %c0 = arith.constant 0 : index
    %c0_0 = arith.constant 0 : index
    %c0_1 = arith.constant 0 : index
    %0 = vector.load %arg2[%c0, %c0_0, %c0_1] : memref<3x16x16xf32, #tpu.memory_space<vmem>>, vector<1x16x16xf32>
    %1 = vector.shape_cast %0 : vector<1x16x16xf32> to vector<16x16xf32>
    %c0_2 = arith.constant 0 : index
    %c0_3 = arith.constant 0 : index
    %c0_4 = arith.constant 0 : index
    %c0_5 = arith.constant 0 : index
    %2 = vector.load %arg1[%c0_2, %c0_3, %c0_4, %c0_5] : memref<1x4x16x8xf32, #tpu.memory_space<vmem>>, vector<1x1x16x8xf32>
    %3 = vector.shape_cast %2 : vector<1x1x16x8xf32> to vector<16x8xf32>
    %cst = arith.constant dense<0.000000e+00> : vector<16x8xf32>
    %4 = tpu.matmul %1, %3, %cst {dimension_numbers = #tpu.dot_dimension_numbers<[1], [0], [0], [1], [0, 0, 1, 1], [], []>} : vector<16x16xf32>, vector<16x8xf32>, vector<16x8xf32> -> vector<16x8xf32>
    %c0_6 = arith.constant 0 : index
    %c0_7 = arith.constant 0 : index
    %c0_8 = arith.constant 0 : index
    %c0_9 = arith.constant 0 : index
    %5 = vector.load %arg3[%c0_6, %c0_7, %c0_8, %c0_9] : memref<1x24x16x8xf32, #tpu.memory_space<vmem>>, vector<1x1x16x8xf32>
    %6 = vector.shape_cast %5 : vector<1x1x16x8xf32> to vector<16x8xf32>
    %7 = vector.shape_cast %4 : vector<16x8xf32> to vector<1x1x16x8xf32>
    tpu.vector_store %arg3[%c0_6, %c0_7, %c0_8, %c0_9], %7 {strides = array<i32>} : memref<1x24x16x8xf32, #tpu.memory_space<vmem>>, vector<1x1x16x8xf32>,
    %cst_10 = arith.constant dense<0.000000e+00> : vector<16x8xf32>
    %8 = tpu.matmul %1, %4, %cst_10 {dimension_numbers = #tpu.dot_dimension_numbers<[1], [0], [0], [1], [0, 0, 1, 1], [], []>} : vector<16x16xf32>, vector<16x8xf32>, vector<16x8xf32> -> vector<16x8xf32>
    %c0_11 = arith.constant 0 : index
    %c4 = arith.constant 4 : index
    %c0_12 = arith.constant 0 : index
    %c0_13 = arith.constant 0 : index
    %9 = vector.load %arg3[%c0_11, %c4, %c0_12, %c0_13] : memref<1x24x16x8xf32, #tpu.memory_space<vmem>>, vector<1x1x16x8xf32>
    %10 = vector.shape_cast %9 : vector<1x1x16x8xf32> to vector<16x8xf32>
    %11 = vector.shape_cast %8 : vector<16x8xf32> to vector<1x1x16x8xf32>
    tpu.vector_store %arg3[%c0_11, %c4, %c0_12, %c0_13], %11 {strides = array<i32>} : memref<1x24x16x8xf32, #tpu.memory_space<vmem>>, vector<1x1x16x8xf32>,
    %c0_14 = arith.constant 0 : index
    %c1 = arith.constant 1 : index
    %c0_15 = arith.constant 0 : index
    %c0_16 = arith.constant 0 : index
    %12 = vector.load %arg1[%c0_14, %c1, %c0_15, %c0_16] : memref<1x4x16x8xf32, #tpu.memory_space<vmem>>, vector<1x1x16x8xf32>
    %13 = vector.shape_cast %12 : vector<1x1x16x8xf32> to vector<16x8xf32>
    %cst_17 = arith.constant dense<0.000000e+00> : vector<16x8xf32>
    %14 = tpu.matmul %1, %13, %cst_17 {dimension_numbers = #tpu.dot_dimension_numbers<[1], [0], [0], [1], [0, 0, 1, 1], [], []>} : vector<16x16xf32>, vector<16x8xf32>, vector<16x8xf32> -> vector<16x8xf32>
    %c0_18 = arith.constant 0 : index
    %c1_19 = arith.constant 1 : index
    %c0_20 = arith.constant 0 : index
    %c0_21 = arith.constant 0 : index
    %15 = vector.load %arg3[%c0_18, %c1_19, %c0_20, %c0_21] : memref<1x24x16x8xf32, #tpu.memory_space<vmem>>, vector<1x1x16x8xf32>
    %16 = vector.shape_cast %15 : vector<1x1x16x8xf32> to vector<16x8xf32>
    %17 = vector.shape_cast %14 : vector<16x8xf32> to vector<1x1x16x8xf32>
    tpu.vector_store %arg3[%c0_18, %c1_19, %c0_20, %c0_21], %17 {strides = array<i32>} : memref<1x24x16x8xf32, #tpu.memory_space<vmem>>, vector<1x1x16x8xf32>,
    %cst_22 = arith.constant dense<0.000000e+00> : vector<16x8xf32>
    %18 = tpu.matmul %1, %14, %cst_22 {dimension_numbers = #tpu.dot_dimension_numbers<[1], [0], [0], [1], [0, 0, 1, 1], [], []>} : vector<16x16xf32>, vector<16x8xf32>, vector<16x8xf32> -> vector<16x8xf32>
    %c0_23 = arith.constant 0 : index
    %c5 = arith.constant 5 : index
    %c0_24 = arith.constant 0 : index
    %c0_25 = arith.constant 0 : index
    %19 = vector.load %arg3[%c0_23, %c5, %c0_24, %c0_25] : memref<1x24x16x8xf32, #tpu.memory_space<vmem>>, vector<1x1x16x8xf32>
    %20 = vector.shape_cast %19 : vector<1x1x16x8xf32> to vector<16x8xf32>
    %21 = vector.shape_cast %18 : vector<16x8xf32> to vector<1x1x16x8xf32>
    tpu.vector_store %arg3[%c0_23, %c5, %c0_24, %c0_25], %21 {strides = array<i32>} : memref<1x24x16x8xf32, #tpu.memory_space<vmem>>, vector<1x1x16x8xf32>,
    %c0_26 = arith.constant 0 : index
    %c2 = arith.constant 2 : index
    %c0_27 = arith.constant 0 : index
    %c0_28 = arith.constant 0 : index
    %22 = vector.load %arg1[%c0_26, %c2, %c0_27, %c0_28] : memref<1x4x16x8xf32, #tpu.memory_space<vmem>>, vector<1x1x16x8xf32>
    %23 = vector.shape_cast %22 : vector<1x1x16x8xf32> to vector<16x8xf32>
    %cst_29 = arith.constant dense<0.000000e+00> : vector<16x8xf32>
    %24 = tpu.matmul %1, %23, %cst_29 {dimension_numbers = #tpu.dot_dimension_numbers<[1], [0], [0], [1], [0, 0, 1, 1], [], []>} : vector<16x16xf32>, vector<16x8xf32>, vector<16x8xf32> -> vector<16x8xf32>
    %c0_30 = arith.constant 0 : index
    %c2_31 = arith.constant 2 : index
    %c0_32 = arith.constant 0 : index
    %c0_33 = arith.constant 0 : index
    %25 = vector.load %arg3[%c0_30, %c2_31, %c0_32, %c0_33] : memref<1x24x16x8xf32, #tpu.memory_space<vmem>>, vector<1x1x16x8xf32>
    %26 = vector.shape_cast %25 : vector<1x1x16x8xf32> to vector<16x8xf32>
    %27 = vector.shape_cast %24 : vector<16x8xf32> to vector<1x1x16x8xf32>
    tpu.vector_store %arg3[%c0_30, %c2_31, %c0_32, %c0_33], %27 {strides = array<i32>} : memref<1x24x16x8xf32, #tpu.memory_space<vmem>>, vector<1x1x16x8xf32>,
    %cst_34 = arith.constant dense<0.000000e+00> : vector<16x8xf32>
    %28 = tpu.matmul %1, %24, %cst_34 {dimension_numbers = #tpu.dot_dimension_numbers<[1], [0], [0], [1], [0, 0, 1, 1], [], []>} : vector<16x16xf32>, vector<16x8xf32>, vector<16x8xf32> -> vector<16x8xf32>
    %c0_35 = arith.constant 0 : index
    %c6 = arith.constant 6 : index
    %c0_36 = arith.constant 0 : index
    %c0_37 = arith.constant 0 : index
    %29 = vector.load %arg3[%c0_35, %c6, %c0_36, %c0_37] : memref<1x24x16x8xf32, #tpu.memory_space<vmem>>, vector<1x1x16x8xf32>
    %30 = vector.shape_cast %29 : vector<1x1x16x8xf32> to vector<16x8xf32>
    %31 = vector.shape_cast %28 : vector<16x8xf32> to vector<1x1x16x8xf32>
    tpu.vector_store %arg3[%c0_35, %c6, %c0_36, %c0_37], %31 {strides = array<i32>} : memref<1x24x16x8xf32, #tpu.memory_space<vmem>>, vector<1x1x16x8xf32>,
    %c0_38 = arith.constant 0 : index
    %c3 = arith.constant 3 : index
    %c0_39 = arith.constant 0 : index
    %c0_40 = arith.constant 0 : index
    %32 = vector.load %arg1[%c0_38, %c3, %c0_39, %c0_40] : memref<1x4x16x8xf32, #tpu.memory_space<vmem>>, vector<1x1x16x8xf32>
    %33 = vector.shape_cast %32 : vector<1x1x16x8xf32> to vector<16x8xf32>
    %cst_41 = arith.constant dense<0.000000e+00> : vector<16x8xf32>
    %34 = tpu.matmul %1, %33, %cst_41 {dimension_numbers = #tpu.dot_dimension_numbers<[1], [0], [0], [1], [0, 0, 1, 1], [], []>} : vector<16x16xf32>, vector<16x8xf32>, vector<16x8xf32> -> vector<16x8xf32>
    %c0_42 = arith.constant 0 : index
    %c3_43 = arith.constant 3 : index
    %c0_44 = arith.constant 0 : index
    %c0_45 = arith.constant 0 : index
    %35 = vector.load %arg3[%c0_42, %c3_43, %c0_44, %c0_45] : memref<1x24x16x8xf32, #tpu.memory_space<vmem>>, vector<1x1x16x8xf32>
    %36 = vector.shape_cast %35 : vector<1x1x16x8xf32> to vector<16x8xf32>
    %37 = vector.shape_cast %34 : vector<16x8xf32> to vector<1x1x16x8xf32>
    tpu.vector_store %arg3[%c0_42, %c3_43, %c0_44, %c0_45], %37 {strides = array<i32>} : memref<1x24x16x8xf32, #tpu.memory_space<vmem>>, vector<1x1x16x8xf32>,
    %cst_46 = arith.constant dense<0.000000e+00> : vector<16x8xf32>
    %38 = tpu.matmul %1, %34, %cst_46 {dimension_numbers = #tpu.dot_dimension_numbers<[1], [0], [0], [1], [0, 0, 1, 1], [], []>} : vector<16x16xf32>, vector<16x8xf32>, vector<16x8xf32> -> vector<16x8xf32>
    %c0_47 = arith.constant 0 : index
    %c7 = arith.constant 7 : index
    %c0_48 = arith.constant 0 : index
    %c0_49 = arith.constant 0 : index
    %39 = vector.load %arg3[%c0_47, %c7, %c0_48, %c0_49] : memref<1x24x16x8xf32, #tpu.memory_space<vmem>>, vector<1x1x16x8xf32>
    %40 = vector.shape_cast %39 : vector<1x1x16x8xf32> to vector<16x8xf32>
    %41 = vector.shape_cast %38 : vector<16x8xf32> to vector<1x1x16x8xf32>
    tpu.vector_store %arg3[%c0_47, %c7, %c0_48, %c0_49], %41 {strides = array<i32>} : memref<1x24x16x8xf32, #tpu.memory_space<vmem>>, vector<1x1x16x8xf32>,
    %c1_50 = arith.constant 1 : index
    %c0_51 = arith.constant 0 : index
    %c0_52 = arith.constant 0 : index
    %42 = vector.load %arg2[%c1_50, %c0_51, %c0_52] : memref<3x16x16xf32, #tpu.memory_space<vmem>>, vector<1x16x16xf32>
    %43 = vector.shape_cast %42 : vector<1x16x16xf32> to vector<16x16xf32>
    %c0_53 = arith.constant 0 : index
    %c0_54 = arith.constant 0 : index
    %c0_55 = arith.constant 0 : index
    %c0_56 = arith.constant 0 : index
    %44 = vector.load %arg1[%c0_53, %c0_54, %c0_55, %c0_56] : memref<1x4x16x8xf32, #tpu.memory_space<vmem>>, vector<1x1x16x8xf32>
    %45 = vector.shape_cast %44 : vector<1x1x16x8xf32> to vector<16x8xf32>
    %cst_57 = arith.constant dense<0.000000e+00> : vector<16x8xf32>
    %46 = tpu.matmul %43, %45, %cst_57 {dimension_numbers = #tpu.dot_dimension_numbers<[1], [0], [0], [1], [0, 0, 1, 1], [], []>} : vector<16x16xf32>, vector<16x8xf32>, vector<16x8xf32> -> vector<16x8xf32>
    %c0_58 = arith.constant 0 : index
    %c8 = arith.constant 8 : index
    %c0_59 = arith.constant 0 : index
    %c0_60 = arith.constant 0 : index
    %47 = vector.load %arg3[%c0_58, %c8, %c0_59, %c0_60] : memref<1x24x16x8xf32, #tpu.memory_space<vmem>>, vector<1x1x16x8xf32>
    %48 = vector.shape_cast %47 : vector<1x1x16x8xf32> to vector<16x8xf32>
    %49 = vector.shape_cast %46 : vector<16x8xf32> to vector<1x1x16x8xf32>
    tpu.vector_store %arg3[%c0_58, %c8, %c0_59, %c0_60], %49 {strides = array<i32>} : memref<1x24x16x8xf32, #tpu.memory_space<vmem>>, vector<1x1x16x8xf32>,
    %cst_61 = arith.constant dense<0.000000e+00> : vector<16x8xf32>
    %50 = tpu.matmul %43, %46, %cst_61 {dimension_numbers = #tpu.dot_dimension_numbers<[1], [0], [0], [1], [0, 0, 1, 1], [], []>} : vector<16x16xf32>, vector<16x8xf32>, vector<16x8xf32> -> vector<16x8xf32>
    %c0_62 = arith.constant 0 : index
    %c12 = arith.constant 12 : index
    %c0_63 = arith.constant 0 : index
    %c0_64 = arith.constant 0 : index
    %51 = vector.load %arg3[%c0_62, %c12, %c0_63, %c0_64] : memref<1x24x16x8xf32, #tpu.memory_space<vmem>>, vector<1x1x16x8xf32>
    %52 = vector.shape_cast %51 : vector<1x1x16x8xf32> to vector<16x8xf32>
    %53 = vector.shape_cast %50 : vector<16x8xf32> to vector<1x1x16x8xf32>
    tpu.vector_store %arg3[%c0_62, %c12, %c0_63, %c0_64], %53 {strides = array<i32>} : memref<1x24x16x8xf32, #tpu.memory_space<vmem>>, vector<1x1x16x8xf32>,
    %c0_65 = arith.constant 0 : index
    %c1_66 = arith.constant 1 : index
    %c0_67 = arith.constant 0 : index
    %c0_68 = arith.constant 0 : index
    %54 = vector.load %arg1[%c0_65, %c1_66, %c0_67, %c0_68] : memref<1x4x16x8xf32, #tpu.memory_space<vmem>>, vector<1x1x16x8xf32>
    %55 = vector.shape_cast %54 : vector<1x1x16x8xf32> to vector<16x8xf32>
    %cst_69 = arith.constant dense<0.000000e+00> : vector<16x8xf32>
    %56 = tpu.matmul %43, %55, %cst_69 {dimension_numbers = #tpu.dot_dimension_numbers<[1], [0], [0], [1], [0, 0, 1, 1], [], []>} : vector<16x16xf32>, vector<16x8xf32>, vector<16x8xf32> -> vector<16x8xf32>
    %c0_70 = arith.constant 0 : index
    %c9 = arith.constant 9 : index
    %c0_71 = arith.constant 0 : index
    %c0_72 = arith.constant 0 : index
    %57 = vector.load %arg3[%c0_70, %c9, %c0_71, %c0_72] : memref<1x24x16x8xf32, #tpu.memory_space<vmem>>, vector<1x1x16x8xf32>
    %58 = vector.shape_cast %57 : vector<1x1x16x8xf32> to vector<16x8xf32>
    %59 = vector.shape_cast %56 : vector<16x8xf32> to vector<1x1x16x8xf32>
    tpu.vector_store %arg3[%c0_70, %c9, %c0_71, %c0_72], %59 {strides = array<i32>} : memref<1x24x16x8xf32, #tpu.memory_space<vmem>>, vector<1x1x16x8xf32>,
    %cst_73 = arith.constant dense<0.000000e+00> : vector<16x8xf32>
    %60 = tpu.matmul %43, %56, %cst_73 {dimension_numbers = #tpu.dot_dimension_numbers<[1], [0], [0], [1], [0, 0, 1, 1], [], []>} : vector<16x16xf32>, vector<16x8xf32>, vector<16x8xf32> -> vector<16x8xf32>
    %c0_74 = arith.constant 0 : index
    %c13 = arith.constant 13 : index
    %c0_75 = arith.constant 0 : index
    %c0_76 = arith.constant 0 : index
    %61 = vector.load %arg3[%c0_74, %c13, %c0_75, %c0_76] : memref<1x24x16x8xf32, #tpu.memory_space<vmem>>, vector<1x1x16x8xf32>
    %62 = vector.shape_cast %61 : vector<1x1x16x8xf32> to vector<16x8xf32>
    %63 = vector.shape_cast %60 : vector<16x8xf32> to vector<1x1x16x8xf32>
    tpu.vector_store %arg3[%c0_74, %c13, %c0_75, %c0_76], %63 {strides = array<i32>} : memref<1x24x16x8xf32, #tpu.memory_space<vmem>>, vector<1x1x16x8xf32>,
    %c0_77 = arith.constant 0 : index
    %c2_78 = arith.constant 2 : index
    %c0_79 = arith.constant 0 : index
    %c0_80 = arith.constant 0 : index
    %64 = vector.load %arg1[%c0_77, %c2_78, %c0_79, %c0_80] : memref<1x4x16x8xf32, #tpu.memory_space<vmem>>, vector<1x1x16x8xf32>
    %65 = vector.shape_cast %64 : vector<1x1x16x8xf32> to vector<16x8xf32>
    %cst_81 = arith.constant dense<0.000000e+00> : vector<16x8xf32>
    %66 = tpu.matmul %43, %65, %cst_81 {dimension_numbers = #tpu.dot_dimension_numbers<[1], [0], [0], [1], [0, 0, 1, 1], [], []>} : vector<16x16xf32>, vector<16x8xf32>, vector<16x8xf32> -> vector<16x8xf32>
    %c0_82 = arith.constant 0 : index
    %c10 = arith.constant 10 : index
    %c0_83 = arith.constant 0 : index
    %c0_84 = arith.constant 0 : index
    %67 = vector.load %arg3[%c0_82, %c10, %c0_83, %c0_84] : memref<1x24x16x8xf32, #tpu.memory_space<vmem>>, vector<1x1x16x8xf32>
    %68 = vector.shape_cast %67 : vector<1x1x16x8xf32> to vector<16x8xf32>
    %69 = vector.shape_cast %66 : vector<16x8xf32> to vector<1x1x16x8xf32>
    tpu.vector_store %arg3[%c0_82, %c10, %c0_83, %c0_84], %69 {strides = array<i32>} : memref<1x24x16x8xf32, #tpu.memory_space<vmem>>, vector<1x1x16x8xf32>,
    %cst_85 = arith.constant dense<0.000000e+00> : vector<16x8xf32>
    %70 = tpu.matmul %43, %66, %cst_85 {dimension_numbers = #tpu.dot_dimension_numbers<[1], [0], [0], [1], [0, 0, 1, 1], [], []>} : vector<16x16xf32>, vector<16x8xf32>, vector<16x8xf32> -> vector<16x8xf32>
    %c0_86 = arith.constant 0 : index
    %c14 = arith.constant 14 : index
    %c0_87 = arith.constant 0 : index
    %c0_88 = arith.constant 0 : index
    %71 = vector.load %arg3[%c0_86, %c14, %c0_87, %c0_88] : memref<1x24x16x8xf32, #tpu.memory_space<vmem>>, vector<1x1x16x8xf32>
    %72 = vector.shape_cast %71 : vector<1x1x16x8xf32> to vector<16x8xf32>
    %73 = vector.shape_cast %70 : vector<16x8xf32> to vector<1x1x16x8xf32>
    tpu.vector_store %arg3[%c0_86, %c14, %c0_87, %c0_88], %73 {strides = array<i32>} : memref<1x24x16x8xf32, #tpu.memory_space<vmem>>, vector<1x1x16x8xf32>,
    %c0_89 = arith.constant 0 : index
    %c3_90 = arith.constant 3 : index
    %c0_91 = arith.constant 0 : index
    %c0_92 = arith.constant 0 : index
    %74 = vector.load %arg1[%c0_89, %c3_90, %c0_91, %c0_92] : memref<1x4x16x8xf32, #tpu.memory_space<vmem>>, vector<1x1x16x8xf32>
    %75 = vector.shape_cast %74 : vector<1x1x16x8xf32> to vector<16x8xf32>
    %cst_93 = arith.constant dense<0.000000e+00> : vector<16x8xf32>
    %76 = tpu.matmul %43, %75, %cst_93 {dimension_numbers = #tpu.dot_dimension_numbers<[1], [0], [0], [1], [0, 0, 1, 1], [], []>} : vector<16x16xf32>, vector<16x8xf32>, vector<16x8xf32> -> vector<16x8xf32>
    %c0_94 = arith.constant 0 : index
    %c11 = arith.constant 11 : index
    %c0_95 = arith.constant 0 : index
    %c0_96 = arith.constant 0 : index
    %77 = vector.load %arg3[%c0_94, %c11, %c0_95, %c0_96] : memref<1x24x16x8xf32, #tpu.memory_space<vmem>>, vector<1x1x16x8xf32>
    %78 = vector.shape_cast %77 : vector<1x1x16x8xf32> to vector<16x8xf32>
    %79 = vector.shape_cast %76 : vector<16x8xf32> to vector<1x1x16x8xf32>
    tpu.vector_store %arg3[%c0_94, %c11, %c0_95, %c0_96], %79 {strides = array<i32>} : memref<1x24x16x8xf32, #tpu.memory_space<vmem>>, vector<1x1x16x8xf32>,
    %cst_97 = arith.constant dense<0.000000e+00> : vector<16x8xf32>
    %80 = tpu.matmul %43, %76, %cst_97 {dimension_numbers = #tpu.dot_dimension_numbers<[1], [0], [0], [1], [0, 0, 1, 1], [], []>} : vector<16x16xf32>, vector<16x8xf32>, vector<16x8xf32> -> vector<16x8xf32>
    %c0_98 = arith.constant 0 : index
    %c15 = arith.constant 15 : index
    %c0_99 = arith.constant 0 : index
    %c0_100 = arith.constant 0 : index
    %81 = vector.load %arg3[%c0_98, %c15, %c0_99, %c0_100] : memref<1x24x16x8xf32, #tpu.memory_space<vmem>>, vector<1x1x16x8xf32>
    %82 = vector.shape_cast %81 : vector<1x1x16x8xf32> to vector<16x8xf32>
    %83 = vector.shape_cast %80 : vector<16x8xf32> to vector<1x1x16x8xf32>
    tpu.vector_store %arg3[%c0_98, %c15, %c0_99, %c0_100], %83 {strides = array<i32>} : memref<1x24x16x8xf32, #tpu.memory_space<vmem>>, vector<1x1x16x8xf32>,
    %c2_101 = arith.constant 2 : index
    %c0_102 = arith.constant 0 : index
    %c0_103 = arith.constant 0 : index
    %84 = vector.load %arg2[%c2_101, %c0_102, %c0_103] : memref<3x16x16xf32, #tpu.memory_space<vmem>>, vector<1x16x16xf32>
    %85 = vector.shape_cast %84 : vector<1x16x16xf32> to vector<16x16xf32>
    %c0_104 = arith.constant 0 : index
    %c0_105 = arith.constant 0 : index
    %c0_106 = arith.constant 0 : index
    %c0_107 = arith.constant 0 : index
    %86 = vector.load %arg1[%c0_104, %c0_105, %c0_106, %c0_107] : memref<1x4x16x8xf32, #tpu.memory_space<vmem>>, vector<1x1x16x8xf32>
    %87 = vector.shape_cast %86 : vector<1x1x16x8xf32> to vector<16x8xf32>
    %cst_108 = arith.constant dense<0.000000e+00> : vector<16x8xf32>
    %88 = tpu.matmul %85, %87, %cst_108 {dimension_numbers = #tpu.dot_dimension_numbers<[1], [0], [0], [1], [0, 0, 1, 1], [], []>} : vector<16x16xf32>, vector<16x8xf32>, vector<16x8xf32> -> vector<16x8xf32>
    %c0_109 = arith.constant 0 : index
    %c16 = arith.constant 16 : index
    %c0_110 = arith.constant 0 : index
    %c0_111 = arith.constant 0 : index
    %89 = vector.load %arg3[%c0_109, %c16, %c0_110, %c0_111] : memref<1x24x16x8xf32, #tpu.memory_space<vmem>>, vector<1x1x16x8xf32>
    %90 = vector.shape_cast %89 : vector<1x1x16x8xf32> to vector<16x8xf32>
    %91 = vector.shape_cast %88 : vector<16x8xf32> to vector<1x1x16x8xf32>
    tpu.vector_store %arg3[%c0_109, %c16, %c0_110, %c0_111], %91 {strides = array<i32>} : memref<1x24x16x8xf32, #tpu.memory_space<vmem>>, vector<1x1x16x8xf32>,
    %cst_112 = arith.constant dense<0.000000e+00> : vector<16x8xf32>
    %92 = tpu.matmul %85, %88, %cst_112 {dimension_numbers = #tpu.dot_dimension_numbers<[1], [0], [0], [1], [0, 0, 1, 1], [], []>} : vector<16x16xf32>, vector<16x8xf32>, vector<16x8xf32> -> vector<16x8xf32>
    %c0_113 = arith.constant 0 : index
    %c20 = arith.constant 20 : index
    %c0_114 = arith.constant 0 : index
    %c0_115 = arith.constant 0 : index
    %93 = vector.load %arg3[%c0_113, %c20, %c0_114, %c0_115] : memref<1x24x16x8xf32, #tpu.memory_space<vmem>>, vector<1x1x16x8xf32>
    %94 = vector.shape_cast %93 : vector<1x1x16x8xf32> to vector<16x8xf32>
    %95 = vector.shape_cast %92 : vector<16x8xf32> to vector<1x1x16x8xf32>
    tpu.vector_store %arg3[%c0_113, %c20, %c0_114, %c0_115], %95 {strides = array<i32>} : memref<1x24x16x8xf32, #tpu.memory_space<vmem>>, vector<1x1x16x8xf32>,
    %c0_116 = arith.constant 0 : index
    %c1_117 = arith.constant 1 : index
    %c0_118 = arith.constant 0 : index
    %c0_119 = arith.constant 0 : index
    %96 = vector.load %arg1[%c0_116, %c1_117, %c0_118, %c0_119] : memref<1x4x16x8xf32, #tpu.memory_space<vmem>>, vector<1x1x16x8xf32>
    %97 = vector.shape_cast %96 : vector<1x1x16x8xf32> to vector<16x8xf32>
    %cst_120 = arith.constant dense<0.000000e+00> : vector<16x8xf32>
    %98 = tpu.matmul %85, %97, %cst_120 {dimension_numbers = #tpu.dot_dimension_numbers<[1], [0], [0], [1], [0, 0, 1, 1], [], []>} : vector<16x16xf32>, vector<16x8xf32>, vector<16x8xf32> -> vector<16x8xf32>
    %c0_121 = arith.constant 0 : index
    %c17 = arith.constant 17 : index
    %c0_122 = arith.constant 0 : index
    %c0_123 = arith.constant 0 : index
    %99 = vector.load %arg3[%c0_121, %c17, %c0_122, %c0_123] : memref<1x24x16x8xf32, #tpu.memory_space<vmem>>, vector<1x1x16x8xf32>
    %100 = vector.shape_cast %99 : vector<1x1x16x8xf32> to vector<16x8xf32>
    %101 = vector.shape_cast %98 : vector<16x8xf32> to vector<1x1x16x8xf32>
    tpu.vector_store %arg3[%c0_121, %c17, %c0_122, %c0_123], %101 {strides = array<i32>} : memref<1x24x16x8xf32, #tpu.memory_space<vmem>>, vector<1x1x16x8xf32>,
    %cst_124 = arith.constant dense<0.000000e+00> : vector<16x8xf32>
    %102 = tpu.matmul %85, %98, %cst_124 {dimension_numbers = #tpu.dot_dimension_numbers<[1], [0], [0], [1], [0, 0, 1, 1], [], []>} : vector<16x16xf32>, vector<16x8xf32>, vector<16x8xf32> -> vector<16x8xf32>
    %c0_125 = arith.constant 0 : index
    %c21 = arith.constant 21 : index
    %c0_126 = arith.constant 0 : index
    %c0_127 = arith.constant 0 : index
    %103 = vector.load %arg3[%c0_125, %c21, %c0_126, %c0_127] : memref<1x24x16x8xf32, #tpu.memory_space<vmem>>, vector<1x1x16x8xf32>
    %104 = vector.shape_cast %103 : vector<1x1x16x8xf32> to vector<16x8xf32>
    %105 = vector.shape_cast %102 : vector<16x8xf32> to vector<1x1x16x8xf32>
    tpu.vector_store %arg3[%c0_125, %c21, %c0_126, %c0_127], %105 {strides = array<i32>} : memref<1x24x16x8xf32, #tpu.memory_space<vmem>>, vector<1x1x16x8xf32>,
    %c0_128 = arith.constant 0 : index
    %c2_129 = arith.constant 2 : index
    %c0_130 = arith.constant 0 : index
    %c0_131 = arith.constant 0 : index
    %106 = vector.load %arg1[%c0_128, %c2_129, %c0_130, %c0_131] : memref<1x4x16x8xf32, #tpu.memory_space<vmem>>, vector<1x1x16x8xf32>
    %107 = vector.shape_cast %106 : vector<1x1x16x8xf32> to vector<16x8xf32>
    %cst_132 = arith.constant dense<0.000000e+00> : vector<16x8xf32>
    %108 = tpu.matmul %85, %107, %cst_132 {dimension_numbers = #tpu.dot_dimension_numbers<[1], [0], [0], [1], [0, 0, 1, 1], [], []>} : vector<16x16xf32>, vector<16x8xf32>, vector<16x8xf32> -> vector<16x8xf32>
    %c0_133 = arith.constant 0 : index
    %c18 = arith.constant 18 : index
    %c0_134 = arith.constant 0 : index
    %c0_135 = arith.constant 0 : index
    %109 = vector.load %arg3[%c0_133, %c18, %c0_134, %c0_135] : memref<1x24x16x8xf32, #tpu.memory_space<vmem>>, vector<1x1x16x8xf32>
    %110 = vector.shape_cast %109 : vector<1x1x16x8xf32> to vector<16x8xf32>
    %111 = vector.shape_cast %108 : vector<16x8xf32> to vector<1x1x16x8xf32>
    tpu.vector_store %arg3[%c0_133, %c18, %c0_134, %c0_135], %111 {strides = array<i32>} : memref<1x24x16x8xf32, #tpu.memory_space<vmem>>, vector<1x1x16x8xf32>,
    %cst_136 = arith.constant dense<0.000000e+00> : vector<16x8xf32>
    %112 = tpu.matmul %85, %108, %cst_136 {dimension_numbers = #tpu.dot_dimension_numbers<[1], [0], [0], [1], [0, 0, 1, 1], [], []>} : vector<16x16xf32>, vector<16x8xf32>, vector<16x8xf32> -> vector<16x8xf32>
    %c0_137 = arith.constant 0 : index
    %c22 = arith.constant 22 : index
    %c0_138 = arith.constant 0 : index
    %c0_139 = arith.constant 0 : index
    %113 = vector.load %arg3[%c0_137, %c22, %c0_138, %c0_139] : memref<1x24x16x8xf32, #tpu.memory_space<vmem>>, vector<1x1x16x8xf32>
    %114 = vector.shape_cast %113 : vector<1x1x16x8xf32> to vector<16x8xf32>
    %115 = vector.shape_cast %112 : vector<16x8xf32> to vector<1x1x16x8xf32>
    tpu.vector_store %arg3[%c0_137, %c22, %c0_138, %c0_139], %115 {strides = array<i32>} : memref<1x24x16x8xf32, #tpu.memory_space<vmem>>, vector<1x1x16x8xf32>,
    %c0_140 = arith.constant 0 : index
    %c3_141 = arith.constant 3 : index
    %c0_142 = arith.constant 0 : index
    %c0_143 = arith.constant 0 : index
    %116 = vector.load %arg1[%c0_140, %c3_141, %c0_142, %c0_143] : memref<1x4x16x8xf32, #tpu.memory_space<vmem>>, vector<1x1x16x8xf32>
    %117 = vector.shape_cast %116 : vector<1x1x16x8xf32> to vector<16x8xf32>
    %cst_144 = arith.constant dense<0.000000e+00> : vector<16x8xf32>
    %118 = tpu.matmul %85, %117, %cst_144 {dimension_numbers = #tpu.dot_dimension_numbers<[1], [0], [0], [1], [0, 0, 1, 1], [], []>} : vector<16x16xf32>, vector<16x8xf32>, vector<16x8xf32> -> vector<16x8xf32>
    %c0_145 = arith.constant 0 : index
    %c19 = arith.constant 19 : index
    %c0_146 = arith.constant 0 : index
    %c0_147 = arith.constant 0 : index
    %119 = vector.load %arg3[%c0_145, %c19, %c0_146, %c0_147] : memref<1x24x16x8xf32, #tpu.memory_space<vmem>>, vector<1x1x16x8xf32>
    %120 = vector.shape_cast %119 : vector<1x1x16x8xf32> to vector<16x8xf32>
    %121 = vector.shape_cast %118 : vector<16x8xf32> to vector<1x1x16x8xf32>
    tpu.vector_store %arg3[%c0_145, %c19, %c0_146, %c0_147], %121 {strides = array<i32>} : memref<1x24x16x8xf32, #tpu.memory_space<vmem>>, vector<1x1x16x8xf32>,
    %cst_148 = arith.constant dense<0.000000e+00> : vector<16x8xf32>
    %122 = tpu.matmul %85, %118, %cst_148 {dimension_numbers = #tpu.dot_dimension_numbers<[1], [0], [0], [1], [0, 0, 1, 1], [], []>} : vector<16x16xf32>, vector<16x8xf32>, vector<16x8xf32> -> vector<16x8xf32>
    %c0_149 = arith.constant 0 : index
    %c23 = arith.constant 23 : index
    %c0_150 = arith.constant 0 : index
    %c0_151 = arith.constant 0 : index
    %123 = vector.load %arg3[%c0_149, %c23, %c0_150, %c0_151] : memref<1x24x16x8xf32, #tpu.memory_space<vmem>>, vector<1x1x16x8xf32>
    %124 = vector.shape_cast %123 : vector<1x1x16x8xf32> to vector<16x8xf32>
    %125 = vector.shape_cast %122 : vector<16x8xf32> to vector<1x1x16x8xf32>
    tpu.vector_store %arg3[%c0_149, %c23, %c0_150, %c0_151], %125 {strides = array<i32>} : memref<1x24x16x8xf32, #tpu.memory_space<vmem>>, vector<1x1x16x8xf32>,
    return
  }
  func.func @transform_0(%arg0: i32) -> (i32, i32, i32, i32) {
    %c0_i32 = arith.constant 0 : i32
    %c0_i32_0 = arith.constant 0 : i32
    %c0_i32_1 = arith.constant 0 : i32
    %c0_i32_2 = arith.constant 0 : i32
    return %arg0, %c0_i32, %c0_i32_0, %c0_i32_1 : i32, i32, i32, i32
  }
  func.func @transform_1(%arg0: i32) -> (i32, i32, i32) {
    %c0_i32 = arith.constant 0 : i32
    %c0_i32_0 = arith.constant 0 : i32
    %c0_i32_1 = arith.constant 0 : i32
    %c0_i32_2 = arith.constant 0 : i32
    return %c0_i32, %c0_i32_0, %c0_i32_1 : i32, i32, i32
  }
  func.func @transform_2(%arg0: i32) -> (i32, i32, i32, i32) {
    %c0_i32 = arith.constant 0 : i32
    %c0_i32_0 = arith.constant 0 : i32
    %c0_i32_1 = arith.constant 0 : i32
    %c0_i32_2 = arith.constant 0 : i32
    return %arg0, %c0_i32, %c0_i32_0, %c0_i32_1 : i32, i32, i32, i32
  }
}

</mosaic_0001>

<bundles_post_ra>
// kernel: tpu_custom_call.1
= control target key start
LH: loop header
LB: loop body
LE: loop exit
PB: predicated region body
PF: predicated region fallthrough
CT: control target
= control target key end

     0   :  { %s2644_s9 = smov 0   ;;  %s2889_s0 = inlined_call_operand.vmem [shape: f32[2,4,16,8], index: 0, kind: input, shape index: {}]   ;;  %s2890_s1 = inlined_call_operand.vmem [shape: f32[3,16,16], index: 1, kind: input, shape index: {}]   ;;  %s2891_s2 = inlined_call_operand.vmem [shape: f32[2,24,16,8], index: 2, kind: output, shape index: {}]  }
   0x1 LB: > { %s2125_s10 = sadd.s32 4294967295, %s2627_s9   ;;  %p2129_p0 = scmp.ge.s32.totalorder %s2627_s9, 1  ;;  %s2627_s9 = sphi %s2644_s9, %s12_s9  }
   0x2   : > { %p112_p1 = scmp.lt.s32.totalorder %s2627_s9, 3 }
   0x4   : > { %p113_p2 = pnand %p2129_p0, %p112_p1 }
   0x5   : > { %p134_p3 = scmp.lt.s32.totalorder (!%p113_p2), %s2125_s10, 1  ;;  %v2655_v0 = vld [vmem:[%s2890_s1] sm:$0xff] (!%p113_p2)  ;;  %vm148_vm0 = vcmask (!%p113_p2), 130048   ;;  %v2670_v9 = vld [vmem:[%s2890_s1 + $0x8] sm:$0xff] (!%p113_p2)  ;;  %v2687_v14 = vld [vmem:[%s2890_s1 + $0x10] sm:$0xff] (!%p113_p2)  ;;  %vm230_vm1 = vcmask (!%p113_p2), 64512  }
   0x6   : > { %116 = sbr.rel (%p113_p2) target bundleno = 500 (0x1f4), region = 28  ;;  %2352 = vmatprep.mubr.msk.f32.mxu0 (!%p113_p2), %vm148_vm0, %v2655_v0  ;;  %2359 = vmatprep.mubr.msk.f32.mxu1 (!%p113_p2), %vm148_vm0, %v2655_v0  ;;  %v2696_v15 = vld [vmem:[%s2890_s1 + $0x18] sm:$0xff] (!%p113_p2)  ;;  %v2713_v16 = vld [vmem:[%s2890_s1 + $0x20] sm:$0xff] (!%p113_p2)  ;;  %v2722_v17 = vld [vmem:[%s2890_s1 + $0x28] sm:$0xff] (!%p113_p2) }
   0xd   : > { %s2893_s10 = smov (!%p134_p3, %s2125_s10), 1 }
   0xe   : > { %s2251_s13 = sshll.u32 %s2893_s10, 6  ;;  %s2612_s27 = smul.u32 384, %s2893_s10 }
   0xf   : > { %s138_s16 = scalar_lea.vmem %s2889_s0, %s2251_s13 }
  0x10   : > { %v146_v1 = vld [vmem:[%s138_s16] sm:$0xff]  ;;  %v147_v2 = vld [vmem:[%s138_s16 + $0x8] sm:$0xff]  ;;  %v2139_v3 = vld [vmem:[%s138_s16 + $0x10] sm:$0xff]  ;;  %s2742_s30 = scalar_lea.vmem %s2891_s2, %s2612_s27 }
  0x11   : > { %v2516_v4 = vpack.c.bf16 %v147_v2, %v146_v1  ;;  %v2140_v5 = vld [vmem:[%s138_s16 + $0x18] sm:$0xff]  ;;  %v2149_v7 = vld [vmem:[%s138_s16 + $0x20] sm:$0xff]  ;;  %v2150_v8 = vld [vmem:[%s138_s16 + $0x28] sm:$0xff] }
  0x12   : > { %v2524_v6 = vpack.c.bf16 %v2140_v5, %v2139_v3  ;;  %v2532_v10 = vpack.c.bf16 %v2150_v8, %v2149_v7  ;;  %v2159_v11 = vld [vmem:[%s138_s16 + $0x30] sm:$0xff]  ;;  %v2160_v12 = vld [vmem:[%s138_s16 + $0x38] sm:$0xff] }
  0x13   : > { %2517 = vmatprep.subr.bf16.mxu0 %v2516_v4  ;;  %v2540_v13 = vpack.c.bf16 %v2160_v12, %v2159_v11 }
  0x14   : > { %2519 = vmatpush3.bf16.msra.mxu0 %v2516_v4 }
  0x15   : > { %2525 = vmatprep.subr.bf16.mxu0 %v2524_v6 }
  0x17   : > { %2353 = vmatmul.mubr.msk.f32.vlgmr.msra.gmra.mrb[0].mxu0 %vm148_vm0, %v2670_v9 }
  0x18   : > { %2527 = vmatpush3.bf16.msra.mxu0 %v2524_v6  ;;  %2366 = vmatprep.mubr.msk.f32.mxu0 %vm148_vm0, %v2655_v0 }
  0x19   : > { %2533 = vmatprep.subr.bf16.mxu0 %v2532_v10 }
  0x1b   : > { %2367 = vmatmul.mubr.msk.f32.vlgmr.msra.gmra.mrb[2].mxu0 %vm148_vm0, %v2670_v9 }
  0x1c   : > { %2535 = vmatpush3.bf16.msra.mxu0 %v2532_v10  ;;  %2380 = vmatprep.mubr.msk.f32.mxu0 %vm148_vm0, %v2655_v0 }
  0x1d   : > { %2541 = vmatprep.subr.bf16.mxu0 %v2540_v13 }
  0x1f   : > { %2381 = vmatmul.mubr.msk.f32.vlgmr.msra.gmra.mrb[4].mxu0 %vm148_vm0, %v2670_v9 }
  0x20   : > { %2543 = vmatpush3.bf16.msra.mxu0 %v2540_v13  ;;  %2394 = vmatprep.mubr.msk.f32.mxu0 %vm148_vm0, %v2655_v0 }
  0x21   : > { %2549 = vmatprep.subr.bf16.mxu0 %v2516_v4 }
  0x23   : > { %2395 = vmatmul.mubr.msk.f32.vlgmr.msra.gmra.mrb[6].mxu0 %vm148_vm0, %v2670_v9 }
  0x24   : > { %2551 = vmatpush3.bf16.msra.mxu0 %v2516_v4  ;;  %2408 = vmatprep.mubr.msk.f32.mxu0 %vm148_vm0, %v2687_v14 }
  0x25   : > { %2557 = vmatprep.subr.bf16.mxu0 %v2524_v6 }
  0x27   : > { %2409 = vmatmul.mubr.msk.f32.vlgmr.msra.gmra.mrb[8].mxu0 %vm148_vm0, %v2696_v15 }
  0x28   : > { %2559 = vmatpush3.bf16.msra.mxu0 %v2524_v6  ;;  %2422 = vmatprep.mubr.msk.f32.mxu0 %vm148_vm0, %v2687_v14 }
  0x29   : > { %2565 = vmatprep.subr.bf16.mxu0 %v2532_v10 }
  0x2b   : > { %2423 = vmatmul.mubr.msk.f32.vlgmr.msra.gmra.mrb[10].mxu0 %vm148_vm0, %v2696_v15 }
  0x2c   : > { %2567 = vmatpush3.bf16.msra.mxu0 %v2532_v10  ;;  %2436 = vmatprep.mubr.msk.f32.mxu0 %vm148_vm0, %v2687_v14 }
  0x2d   : > { %2573 = vmatprep.subr.bf16.mxu0 %v2540_v13 }
  0x2f   : > { %2437 = vmatmul.mubr.msk.f32.vlgmr.msra.gmra.mrb[12].mxu0 %vm148_vm0, %v2696_v15 }
  0x30   : > { %2575 = vmatpush3.bf16.msra.mxu0 %v2540_v13  ;;  %2450 = vmatprep.mubr.msk.f32.mxu0 %vm148_vm0, %v2687_v14 }
  0x31   : > { %2581 = vmatprep.subr.bf16.mxu0 %v2516_v4 }
  0x33   : > { %2451 = vmatmul.mubr.msk.f32.vlgmr.msra.gmra.mrb[14].mxu0 %vm148_vm0, %v2696_v15 }
  0x34   : > { %2583 = vmatpush3.bf16.msra.mxu0 %v2516_v4  ;;  %2464 = vmatprep.mubr.msk.f32.mxu0 %vm148_vm0, %v2713_v16 }
  0x35   : > { %2589 = vmatprep.subr.bf16.mxu0 %v2524_v6 }
  0x37   : > { %2465 = vmatmul.mubr.msk.f32.vlgmr.msra.gmra.mrb[16].mxu0 %vm148_vm0, %v2722_v17 }
  0x38   : > { %2591 = vmatpush3.bf16.msra.mxu0 %v2524_v6  ;;  %2478 = vmatprep.mubr.msk.f32.mxu0 %vm148_vm0, %v2713_v16 }
  0x39   : > { %2597 = vmatprep.subr.bf16.mxu0 %v2532_v10 }
  0x3b   : > { %2479 = vmatmul.mubr.msk.f32.vlgmr.msra.gmra.mrb[18].mxu0 %vm148_vm0, %v2722_v17 }
  0x3c   : > { %2599 = vmatpush3.bf16.msra.mxu0 %v2532_v10  ;;  %2492 = vmatprep.mubr.msk.f32.mxu0 %vm148_vm0, %v2713_v16 }
  0x3d   : > { %2605 = vmatprep.subr.bf16.mxu0 %v2540_v13 }
  0x3f   : > { %2493 = vmatmul.mubr.msk.f32.vlgmr.msra.gmra.mrb[20].mxu0 %vm148_vm0, %v2722_v17 }
  0x40   : > { %2607 = vmatpush3.bf16.msra.mxu0 %v2540_v13  ;;  %2506 = vmatprep.mubr.msk.f32.mxu0 %vm148_vm0, %v2713_v16 }
  0x43   : > { %2507 = vmatmul.mubr.msk.f32.vlgmr.msra.gmra.mrb[22].mxu0 %vm148_vm0, %v2722_v17 }
  0xea   : > { %v2354_v18 = vpop.f32.mrb[0].mxu0 }
  0xeb   : > { %232 = vst.msk [vmem:[%s2742_s30 + $0x8] sm:$0xff] %vm230_vm1, %v2354_v18  ;;  %v221_v19 = vpop.f32.mrb[1].mxu0 }
  0xec   : > { %231 = vst.msk [vmem:[%s2742_s30] sm:$0xff] %vm230_vm1, %v221_v19  ;;  %v2520_v20 = vpack.c.bf16 %v2354_v18, %v221_v19 }
  0xee   : > { %2521 = vmatprep.subr.bf16.mxu1 %v2520_v20  ;;  %v2368_v21 = vpop.f32.mrb[2].mxu0 }
  0xef   : > { %2144 = vst.msk [vmem:[%s2742_s30 + $0x18] sm:$0xff] %vm230_vm1, %v2368_v21  ;;  %2523 = vmatpush3.bf16.msra.mxu1 %v2520_v20  ;;  %v380_v22 = vpop.f32.mrb[3].mxu0 }
  0xf0   : > { %2143 = vst.msk [vmem:[%s2742_s30 + $0x10] sm:$0xff] %vm230_vm1, %v380_v22  ;;  %v2528_v23 = vpack.c.bf16 %v2368_v21, %v380_v22 }
  0xf2   : > { %2360 = vmatmul.mubr.msk.f32.vlgmr.msra.gmra.mrb[0].mxu1 %vm148_vm0, %v2670_v9  ;;  %2529 = vmatprep.subr.bf16.mxu1 %v2528_v23  ;;  %v2382_v24 = vpop.f32.mrb[4].mxu0 }
  0xf3   : > { %2154 = vst.msk [vmem:[%s2742_s30 + $0x28] sm:$0xff] %vm230_vm1, %v2382_v24  ;;  %2531 = vmatpush3.bf16.msra.mxu1 %v2528_v23  ;;  %v539_v25 = vpop.f32.mrb[5].mxu0  ;;  %2373 = vmatprep.mubr.msk.f32.mxu1 %vm148_vm0, %v2655_v0 }
  0xf4   : > { %2153 = vst.msk [vmem:[%s2742_s30 + $0x20] sm:$0xff] %vm230_vm1, %v539_v25  ;;  %v2536_v26 = vpack.c.bf16 %v2382_v24, %v539_v25 }
  0xf6   : > { %2374 = vmatmul.mubr.msk.f32.vlgmr.msra.gmra.mrb[2].mxu1 %vm148_vm0, %v2670_v9  ;;  %2537 = vmatprep.subr.bf16.mxu1 %v2536_v26  ;;  %v2396_v27 = vpop.f32.mrb[6].mxu0 }
  0xf7   : > { %2164 = vst.msk [vmem:[%s2742_s30 + $0x38] sm:$0xff] %vm230_vm1, %v2396_v27  ;;  %2539 = vmatpush3.bf16.msra.mxu1 %v2536_v26  ;;  %v698_v28 = vpop.f32.mrb[7].mxu0  ;;  %2387 = vmatprep.mubr.msk.f32.mxu1 %vm148_vm0, %v2655_v0 }
  0xf8   : > { %2163 = vst.msk [vmem:[%s2742_s30 + $0x30] sm:$0xff] %vm230_vm1, %v698_v28  ;;  %v2544_v29 = vpack.c.bf16 %v2396_v27, %v698_v28 }
  0xfa   : > { %2388 = vmatmul.mubr.msk.f32.vlgmr.msra.gmra.mrb[4].mxu1 %vm148_vm0, %v2670_v9  ;;  %2545 = vmatprep.subr.bf16.mxu1 %v2544_v29  ;;  %v2410_v30 = vpop.f32.mrb[8].mxu0 }
  0xfb   : > { %2174 = vst.msk [vmem:[%s2742_s30 + $0x88] sm:$0xff] %vm230_vm1, %v2410_v30  ;;  %2547 = vmatpush3.bf16.msra.mxu1 %v2544_v29  ;;  %v865_v31 = vpop.f32.mrb[9].mxu0  ;;  %2401 = vmatprep.mubr.msk.f32.mxu1 %vm148_vm0, %v2655_v0 }
  0xfc   : > { %2173 = vst.msk [vmem:[%s2742_s30 + $0x80] sm:$0xff] %vm230_vm1, %v865_v31  ;;  %v2552_v32 = vpack.c.bf16 %v2410_v30, %v865_v31 }
  0xfe   : > { %2402 = vmatmul.mubr.msk.f32.vlgmr.msra.gmra.mrb[6].mxu1 %vm148_vm0, %v2670_v9  ;;  %2553 = vmatprep.subr.bf16.mxu1 %v2552_v32  ;;  %v2424_v33 = vpop.f32.mrb[10].mxu0 }
  0xff   : > { %2184 = vst.msk [vmem:[%s2742_s30 + $0x98] sm:$0xff] %vm230_vm1, %v2424_v33  ;;  %2555 = vmatpush3.bf16.msra.mxu1 %v2552_v32  ;;  %v1023_v34 = vpop.f32.mrb[11].mxu0  ;;  %2415 = vmatprep.mubr.msk.f32.mxu1 %vm148_vm0, %v2687_v14 }
 0x100   : > { %2183 = vst.msk [vmem:[%s2742_s30 + $0x90] sm:$0xff] %vm230_vm1, %v1023_v34  ;;  %v2560_v35 = vpack.c.bf16 %v2424_v33, %v1023_v34 }
 0x102   : > { %2416 = vmatmul.mubr.msk.f32.vlgmr.msra.gmra.mrb[8].mxu1 %vm148_vm0, %v2696_v15  ;;  %2561 = vmatprep.subr.bf16.mxu1 %v2560_v35  ;;  %v2438_v36 = vpop.f32.mrb[12].mxu0 }
 0x103   : > { %2194 = vst.msk [vmem:[%s2742_s30 + $0xa8] sm:$0xff] %vm230_vm1, %v2438_v36  ;;  %2563 = vmatpush3.bf16.msra.mxu1 %v2560_v35  ;;  %v1181_v37 = vpop.f32.mrb[13].mxu0  ;;  %2429 = vmatprep.mubr.msk.f32.mxu1 %vm148_vm0, %v2687_v14 }
 0x104   : > { %2193 = vst.msk [vmem:[%s2742_s30 + $0xa0] sm:$0xff] %vm230_vm1, %v1181_v37  ;;  %v2568_v38 = vpack.c.bf16 %v2438_v36, %v1181_v37 }
 0x106   : > { %2430 = vmatmul.mubr.msk.f32.vlgmr.msra.gmra.mrb[10].mxu1 %vm148_vm0, %v2696_v15  ;;  %2569 = vmatprep.subr.bf16.mxu1 %v2568_v38  ;;  %v2452_v39 = vpop.f32.mrb[14].mxu0 }
 0x107   : > { %2204 = vst.msk [vmem:[%s2742_s30 + $0xb8] sm:$0xff] %vm230_vm1, %v2452_v39  ;;  %2571 = vmatpush3.bf16.msra.mxu1 %v2568_v38  ;;  %v1339_v40 = vpop.f32.mrb[15].mxu0  ;;  %2443 = vmatprep.mubr.msk.f32.mxu1 %vm148_vm0, %v2687_v14 }
 0x108   : > { %2203 = vst.msk [vmem:[%s2742_s30 + $0xb0] sm:$0xff] %vm230_vm1, %v1339_v40  ;;  %v2576_v41 = vpack.c.bf16 %v2452_v39, %v1339_v40 }
 0x10a   : > { %2444 = vmatmul.mubr.msk.f32.vlgmr.msra.gmra.mrb[12].mxu1 %vm148_vm0, %v2696_v15  ;;  %2577 = vmatprep.subr.bf16.mxu1 %v2576_v41  ;;  %v2466_v42 = vpop.f32.mrb[16].mxu0 }
 0x10b   : > { %2214 = vst.msk [vmem:[%s2742_s30 + $0x108] sm:$0xff] %vm230_vm1, %v2466_v42  ;;  %2579 = vmatpush3.bf16.msra.mxu1 %v2576_v41  ;;  %v1506_v43 = vpop.f32.mrb[17].mxu0  ;;  %2457 = vmatprep.mubr.msk.f32.mxu1 %vm148_vm0, %v2687_v14 }
 0x10c   : > { %2213 = vst.msk [vmem:[%s2742_s30 + $0x100] sm:$0xff] %vm230_vm1, %v1506_v43  ;;  %v2584_v44 = vpack.c.bf16 %v2466_v42, %v1506_v43 }
 0x10e   : > { %2458 = vmatmul.mubr.msk.f32.vlgmr.msra.gmra.mrb[14].mxu1 %vm148_vm0, %v2696_v15  ;;  %2585 = vmatprep.subr.bf16.mxu1 %v2584_v44  ;;  %v2480_v45 = vpop.f32.mrb[18].mxu0 }
 0x10f   : > { %2224 = vst.msk [vmem:[%s2742_s30 + $0x118] sm:$0xff] %vm230_vm1, %v2480_v45  ;;  %2587 = vmatpush3.bf16.msra.mxu1 %v2584_v44  ;;  %v1664_v46 = vpop.f32.mrb[19].mxu0  ;;  %2471 = vmatprep.mubr.msk.f32.mxu1 %vm148_vm0, %v2713_v16 }
 0x110   : > { %2223 = vst.msk [vmem:[%s2742_s30 + $0x110] sm:$0xff] %vm230_vm1, %v1664_v46  ;;  %v2592_v47 = vpack.c.bf16 %v2480_v45, %v1664_v46 }
 0x112   : > { %2472 = vmatmul.mubr.msk.f32.vlgmr.msra.gmra.mrb[16].mxu1 %vm148_vm0, %v2722_v17  ;;  %2593 = vmatprep.subr.bf16.mxu1 %v2592_v47  ;;  %v2494_v48 = vpop.f32.mrb[20].mxu0 }
 0x113   : > { %2234 = vst.msk [vmem:[%s2742_s30 + $0x128] sm:$0xff] %vm230_vm1, %v2494_v48  ;;  %2595 = vmatpush3.bf16.msra.mxu1 %v2592_v47  ;;  %v1822_v49 = vpop.f32.mrb[21].mxu0  ;;  %2485 = vmatprep.mubr.msk.f32.mxu1 %vm148_vm0, %v2713_v16 }
 0x114   : > { %2233 = vst.msk [vmem:[%s2742_s30 + $0x120] sm:$0xff] %vm230_vm1, %v1822_v49  ;;  %v2600_v50 = vpack.c.bf16 %v2494_v48, %v1822_v49 }
 0x116   : > { %2486 = vmatmul.mubr.msk.f32.vlgmr.msra.gmra.mrb[18].mxu1 %vm148_vm0, %v2722_v17  ;;  %2601 = vmatprep.subr.bf16.mxu1 %v2600_v50  ;;  %v2508_v51 = vpop.f32.mrb[22].mxu0 }
 0x117   : > { %2244 = vst.msk [vmem:[%s2742_s30 + $0x138] sm:$0xff] %vm230_vm1, %v2508_v51  ;;  %2603 = vmatpush3.bf16.msra.mxu1 %v2600_v50  ;;  %v1980_v52 = vpop.f32.mrb[23].mxu0  ;;  %2499 = vmatprep.mubr.msk.f32.mxu1 %vm148_vm0, %v2713_v16 }
 0x118   : > { %2243 = vst.msk [vmem:[%s2742_s30 + $0x130] sm:$0xff] %vm230_vm1, %v1980_v52  ;;  %v2608_v53 = vpack.c.bf16 %v2508_v51, %v1980_v52 }
 0x11a   : > { %2500 = vmatmul.mubr.msk.f32.vlgmr.msra.gmra.mrb[20].mxu1 %vm148_vm0, %v2722_v17  ;;  %2609 = vmatprep.subr.bf16.mxu1 %v2608_v53 }
 0x11b   : > { %2611 = vmatpush3.bf16.msra.mxu1 %v2608_v53  ;;  %2513 = vmatprep.mubr.msk.f32.mxu1 %vm148_vm0, %v2713_v16 }
 0x11e   : > { %2514 = vmatmul.mubr.msk.f32.vlgmr.msra.gmra.mrb[22].mxu1 %vm148_vm0, %v2722_v17 }
 0x1c5   : > { %v2361_v54 = vpop.f32.mrb[0].mxu1 }
 0x1c6   : > { %2138 = vst.msk [vmem:[%s2742_s30 + $0x48] sm:$0xff] %vm230_vm1, %v2361_v54  ;;  %v299_v55 = vpop.f32.mrb[1].mxu1 }
 0x1c7   : > { %2137 = vst.msk [vmem:[%s2742_s30 + $0x40] sm:$0xff] %vm230_vm1, %v299_v55 }
 0x1c9   : > { %v2375_v56 = vpop.f32.mrb[2].mxu1 }
 0x1ca   : > { %2148 = vst.msk [vmem:[%s2742_s30 + $0x58] sm:$0xff] %vm230_vm1, %v2375_v56  ;;  %v458_v57 = vpop.f32.mrb[3].mxu1 }
 0x1cb   : > { %2147 = vst.msk [vmem:[%s2742_s30 + $0x50] sm:$0xff] %vm230_vm1, %v458_v57 }
 0x1cd   : > { %v2389_v58 = vpop.f32.mrb[4].mxu1 }
 0x1ce   : > { %2158 = vst.msk [vmem:[%s2742_s30 + $0x68] sm:$0xff] %vm230_vm1, %v2389_v58  ;;  %v617_v59 = vpop.f32.mrb[5].mxu1 }
 0x1cf   : > { %2157 = vst.msk [vmem:[%s2742_s30 + $0x60] sm:$0xff] %vm230_vm1, %v617_v59 }
 0x1d1   : > { %v2403_v60 = vpop.f32.mrb[6].mxu1 }
 0x1d2   : > { %2168 = vst.msk [vmem:[%s2742_s30 + $0x78] sm:$0xff] %vm230_vm1, %v2403_v60  ;;  %v776_v61 = vpop.f32.mrb[7].mxu1 }
 0x1d3   : > { %2167 = vst.msk [vmem:[%s2742_s30 + $0x70] sm:$0xff] %vm230_vm1, %v776_v61 }
 0x1d5   : > { %v2417_v62 = vpop.f32.mrb[8].mxu1 }
 0x1d6   : > { %2178 = vst.msk [vmem:[%s2742_s30 + $0xc8] sm:$0xff] %vm230_vm1, %v2417_v62  ;;  %v943_v63 = vpop.f32.mrb[9].mxu1 }
 0x1d7   : > { %2177 = vst.msk [vmem:[%s2742_s30 + $0xc0] sm:$0xff] %vm230_vm1, %v943_v63 }
 0x1d9   : > { %v2431_v0 = vpop.f32.mrb[10].mxu1 }
 0x1da   : > { %2188 = vst.msk [vmem:[%s2742_s30 + $0xd8] sm:$0xff] %vm230_vm1, %v2431_v0  ;;  %v1101_v1 = vpop.f32.mrb[11].mxu1 }
 0x1db   : > { %2187 = vst.msk [vmem:[%s2742_s30 + $0xd0] sm:$0xff] %vm230_vm1, %v1101_v1 }
 0x1dd   : > { %v2445_v2 = vpop.f32.mrb[12].mxu1 }
 0x1de   : > { %2198 = vst.msk [vmem:[%s2742_s30 + $0xe8] sm:$0xff] %vm230_vm1, %v2445_v2  ;;  %v1259_v3 = vpop.f32.mrb[13].mxu1 }
 0x1df   : > { %2197 = vst.msk [vmem:[%s2742_s30 + $0xe0] sm:$0xff] %vm230_vm1, %v1259_v3 }
 0x1e1   : > { %v2459_v4 = vpop.f32.mrb[14].mxu1 }
 0x1e2   : > { %2208 = vst.msk [vmem:[%s2742_s30 + $0xf8] sm:$0xff] %vm230_vm1, %v2459_v4  ;;  %v1417_v5 = vpop.f32.mrb[15].mxu1 }
 0x1e3   : > { %2207 = vst.msk [vmem:[%s2742_s30 + $0xf0] sm:$0xff] %vm230_vm1, %v1417_v5 }
 0x1e5   : > { %v2473_v6 = vpop.f32.mrb[16].mxu1 }
 0x1e6   : > { %2218 = vst.msk [vmem:[%s2742_s30 + $0x148] sm:$0xff] %vm230_vm1, %v2473_v6  ;;  %v1584_v7 = vpop.f32.mrb[17].mxu1 }
 0x1e7   : > { %2217 = vst.msk [vmem:[%s2742_s30 + $0x140] sm:$0xff] %vm230_vm1, %v1584_v7 }
 0x1e9   : > { %v2487_v8 = vpop.f32.mrb[18].mxu1 }
 0x1ea   : > { %2228 = vst.msk [vmem:[%s2742_s30 + $0x158] sm:$0xff] %vm230_vm1, %v2487_v8  ;;  %v1742_v9 = vpop.f32.mrb[19].mxu1 }
 0x1eb   : > { %2227 = vst.msk [vmem:[%s2742_s30 + $0x150] sm:$0xff] %vm230_vm1, %v1742_v9 }
 0x1ed   : > { %v2501_v10 = vpop.f32.mrb[20].mxu1 }
 0x1ee   : > { %2238 = vst.msk [vmem:[%s2742_s30 + $0x168] sm:$0xff] %vm230_vm1, %v2501_v10  ;;  %v1900_v11 = vpop.f32.mrb[21].mxu1 }
 0x1ef   : > { %2237 = vst.msk [vmem:[%s2742_s30 + $0x160] sm:$0xff] %vm230_vm1, %v1900_v11 }
 0x1f1   : > { %v2515_v12 = vpop.f32.mrb[22].mxu1 }
 0x1f2   : > { %2248 = vst.msk [vmem:[%s2742_s30 + $0x178] sm:$0xff] %vm230_vm1, %v2515_v12  ;;  %v2058_v13 = vpop.f32.mrb[23].mxu1 }
 0x1f3   : > { %2247 = vst.msk [vmem:[%s2742_s30 + $0x170] sm:$0xff] %vm230_vm1, %v2058_v13 }
 0x1f4 PF: > { %s12_s9 = sadd.s32 1, %s2627_s9  }
 0x1f5   : > { %p9_p4 = scmp.ge.s32.totalorder %s12_s9, 4  }
 0x1f7   :  { %11 = sbr.rel (!%p9_p4) target bundleno = 1 (0x1), region = 86 }

</bundles_post_ra>
